<compile_context>
chip_gen: v7x
topology: tpu7x:2x2x1
jax: 0.10.0
libtpu: 0.0.40
codegen_flags: <defaults>
</compile_context>

<pallas_src>
import jax
import jax.numpy as jnp
from jax import lax
from jax.experimental import pallas as pl
from jax.experimental.pallas import tpu as pltpu


def _round_up(x, m):
    return ((x + m - 1) // m) * m


def siamese_kernel(a_ref, p_ref, n_ref, w1_ref, b1_ref, w2_ref, b2_ref,
                   out_ref, h_acc):
    """One (batch-tile, K-tile) grid step.

    a_ref/p_ref/n_ref : (TB, TK) f32   anchor / positive / negative slab
    w1_ref            : (TK, HID) bf16 K-slab of layer-1 weights (resident if nk==1)
    b1_ref            : (1, HID)  f32
    w2_ref            : (HID, EMB) bf16 (resident, single-buffered)
    b2_ref            : (1, EMB)  f32
    out_ref           : (TB, 2)   f32  col 0 = ap_similarity, col 1 = an_similarity
    h_acc             : (3*TB, HID) f32 scratch accumulator for the first matmul
    """
    k = pl.program_id(1)
    nk = pl.num_programs(1)
    tb = a_ref.shape[0]

    @pl.when(k == 0)
    def _():
        h_acc[...] = jnp.zeros_like(h_acc)

    # Layer 1: accumulate x @ W1 over the K axis.  Activations arrive as f32
    # straight from HBM and are cast to bf16 here (MXU operands), f32 acc.
    w1 = w1_ref[...]
    h_acc[0 * tb:1 * tb, :] += jnp.dot(a_ref[...].astype(jnp.bfloat16), w1,
                                       preferred_element_type=jnp.float32)
    h_acc[1 * tb:2 * tb, :] += jnp.dot(p_ref[...].astype(jnp.bfloat16), w1,
                                       preferred_element_type=jnp.float32)
    h_acc[2 * tb:3 * tb, :] += jnp.dot(n_ref[...].astype(jnp.bfloat16), w1,
                                       preferred_element_type=jnp.float32)

    @pl.when(k == nk - 1)
    def _():
        # Bias + ReLU in f32 (VPU), layer 2 in bf16 (MXU, f32 acc).
        h = jnp.maximum(h_acc[...] + b1_ref[...], 0.0)
        e = jnp.dot(h.astype(jnp.bfloat16), w2_ref[...],
                    preferred_element_type=jnp.float32) + b2_ref[...]

        ea = e[0 * tb:1 * tb, :]
        ep = e[1 * tb:2 * tb, :]
        en = e[2 * tb:3 * tb, :]

        na = jnp.sum(ea * ea, axis=-1, keepdims=True)
        np_ = jnp.sum(ep * ep, axis=-1, keepdims=True)
        nn_ = jnp.sum(en * en, axis=-1, keepdims=True)
        dap = jnp.sum(ea * ep, axis=-1, keepdims=True)
        dan = jnp.sum(ea * en, axis=-1, keepdims=True)

        # cos = dot / max(|u|*|v|, 1e-8) == dot * rsqrt(max(|u|^2*|v|^2, 1e-16))
        ap = dap * lax.rsqrt(jnp.maximum(na * np_, 1e-16))
        an = dan * lax.rsqrt(jnp.maximum(na * nn_, 1e-16))

        out_ref[...] = jnp.concatenate([ap, an], axis=-1)   # (TB, 2)


def siamese_forward(anchor, positive, negative, w1, b1, w2, b2):
    """anchor/positive/negative: [B, C, H, W] float32 (flattened row-major like
    torch `.view(B, -1)`).  Returns (ap_similarity, an_similarity), each [B]."""
    B = anchor.shape[0]
    D = 1
    for s in anchor.shape[1:]:
        D *= int(s)
    HID = w1.shape[1]
    EMB = w2.shape[1]

    # ---- batch tiling --------------------------------------------------
    if B >= 512:
        TB = 256                     # shrink nb -> fewer W1 re-streams / grid steps
    elif B >= 128:
        TB = 128
    else:
        TB = _round_up(B, 8)         # keep h_acc row-slices sublane-aligned
    Bp = _round_up(B, TB)
    nb = Bp // TB

    # ---- generation-aware VMEM limit ------------------------------------
    vmem_limit = 100 * 1024 * 1024   # v5e / v6e: 128 MiB physical VMEM
    try:
        cap = int(pltpu.get_tpu_info().vmem_capacity_bytes)
        if cap <= 64 * 1024 * 1024:              # v7x-class part: 64 MiB VMEM
            vmem_limit = 40 * 1024 * 1024
        else:
            vmem_limit = min(100 * 1024 * 1024, cap * 3 // 4)
    except Exception:
        vmem_limit = 48 * 1024 * 1024            # conservative fallback

    # ---- contraction slab TK derived from the VMEM budget ----------------
    budget = int(vmem_limit * 0.6)
    fixed = (3 * TB * HID * 4        # h_acc scratch (f32)
             + HID * EMB * 2         # resident W2 (bf16, single-buffered)
             + (HID + EMB) * 4       # b1, b2
             + 2 * TB * 2 * 4)       # (TB, 2) output, double-buffered
    per_col = 3 * 2 * TB * 4 + 2 * HID * 2   # 3 f32 act dbl-buffers + W1 slab
    tk_budget = max(128, (budget - fixed) // per_col)
    tk_cap = max(128, (tk_budget // 128) * 128)

    Dp = _round_up(D, 128)
    if Dp <= tk_cap:
        nk, TK = 1, Dp               # whole W1 VMEM-resident, fetched once
    else:
        nk = -(-Dp // tk_cap)        # balanced K slabs, each a multiple of 128
        TK = _round_up(-(-Dp // nk), 128)
    Dp = nk * TK
    # NOTE: if HID*EMB*2 alone exceeds the budget (very large layers) W2 would
    # also need tiling along EMB; not needed for these shapes.

    # ---- operands: no interleave pre-pass, pad only when required --------
    def prep(x):
        x = x.reshape(B, D)
        if Bp != B or Dp != D:
            x = jnp.pad(x, ((0, Bp - B), (0, Dp - D)))
        return x                      # stays float32; cast to bf16 in-kernel

    a2, p2, n2 = prep(anchor), prep(positive), prep(negative)

    w1p = w1 if Dp == D else jnp.pad(w1, ((0, Dp - D), (0, 0)))
    w1p = w1p.astype(jnp.bfloat16)    # weights: one small host cast, reused
    w2b = w2.astype(jnp.bfloat16)
    b1_2d = b1.reshape(1, HID).astype(jnp.float32)
    b2_2d = b2.reshape(1, EMB).astype(jnp.float32)

    act_spec = pl.BlockSpec((TB, TK), lambda i, k: (i, k))
    if nk == 1:
        w1_spec = pl.BlockSpec((TK, HID), lambda i, k: (0, 0),
                               pipeline_mode=pl.Buffered(1))
    else:
        w1_spec = pl.BlockSpec((TK, HID), lambda i, k: (k, 0))
    b1_spec = pl.BlockSpec((1, HID), lambda i, k: (0, 0),
                           pipeline_mode=pl.Buffered(1))
    w2_spec = pl.BlockSpec((HID, EMB), lambda i, k: (0, 0),
                           pipeline_mode=pl.Buffered(1))
    b2_spec = pl.BlockSpec((1, EMB), lambda i, k: (0, 0),
                           pipeline_mode=pl.Buffered(1))

    out = pl.pallas_call(
        siamese_kernel,
        out_shape=jax.ShapeDtypeStruct((Bp, 2), jnp.float32),
        grid_spec=pltpu.PrefetchScalarGridSpec(
            num_scalar_prefetch=0,
            grid=(nb, nk),            # batch (parallel), K (arbitrary, last)
            in_specs=[act_spec, act_spec, act_spec,
                      w1_spec, b1_spec, w2_spec, b2_spec],
            out_specs=pl.BlockSpec((TB, 2), lambda i, k: (i, 0)),
            scratch_shapes=[pltpu.VMEM((3 * TB, HID), jnp.float32)],
        ),
        compiler_params=pltpu.CompilerParams(
            dimension_semantics=("parallel", "arbitrary"),
            vmem_limit_bytes=int(vmem_limit),
        ),
    )(a2, p2, n2, w1p, b1_2d, w2b, b2_2d)

    return out[:B, 0], out[:B, 1]


def reference_forward(anchor, positive, negative, w1, b1, w2, b2,
                      matmul_dtype=jnp.float32):
    """Pure-JAX reference (same math; matmul_dtype=bfloat16 mirrors the kernel's
    bf16 MXU operands)."""
    B = anchor.shape[0]

    def embed(x):
        x = x.reshape(B, -1).astype(matmul_dtype)
        h = jnp.dot(x, w1.astype(matmul_dtype),
                    preferred_element_type=jnp.float32) + b1
        h = jnp.maximum(h, 0.0)
        return jnp.dot(h.astype(matmul_dtype), w2.astype(matmul_dtype),
                       preferred_element_type=jnp.float32) + b2

    ea, ep, en = embed(anchor), embed(positive), embed(negative)

    def cos(u, v):
        num = jnp.sum(u * v, axis=-1)
        den2 = jnp.sum(u * u, axis=-1) * jnp.sum(v * v, axis=-1)
        return num * lax.rsqrt(jnp.maximum(den2, 1e-16))

    return cos(ea, ep), cos(ea, en)


if __name__ == "__main__":
    # Small shapes consistent with an NCHW siamese embedding tower.
    B, C, H, W = 2, 4, 16, 16
    D = C * H * W          # 1024
    HID = 128
    EMB = 128

    key = jax.random.PRNGKey(0)
    ka, kp, kn, kw1, kw2 = jax.random.split(key, 5)

    anchor = jax.random.normal(ka, (B, C, H, W), jnp.float32)
    positive = jax.random.normal(kp, (B, C, H, W), jnp.float32)
    negative = jax.random.normal(kn, (B, C, H, W), jnp.float32)

    # Deterministic parameter init (Kaiming-ish scaling).
    w1 = jax.random.normal(kw1, (D, HID), jnp.float32) * (2.0 / D) ** 0.5
    b1 = jnp.zeros((HID,), jnp.float32)
    w2 = jax.random.normal(kw2, (HID, EMB), jnp.float32) * (2.0 / HID) ** 0.5
    b2 = jnp.zeros((EMB,), jnp.float32)

    ap_sim, an_sim = siamese_forward(anchor, positive, negative, w1, b1, w2, b2)
    jax.block_until_ready((ap_sim, an_sim))

    assert ap_sim.shape == (B,) and an_sim.shape == (B,)

    # Tight check vs a bf16-matmul-matched reference (structural correctness).
    ap_b, an_b = reference_forward(anchor, positive, negative, w1, b1, w2, b2,
                                   matmul_dtype=jnp.bfloat16)
    assert jnp.allclose(ap_sim, ap_b, atol=5e-3), (ap_sim, ap_b)
    assert jnp.allclose(an_sim, an_b, atol=5e-3), (an_sim, an_b)

    # Loose sanity check vs full-f32 reference (kernel uses bf16 MXU operands).
    ap_f, an_f = reference_forward(anchor, positive, negative, w1, b1, w2, b2)
    assert jnp.allclose(ap_sim, ap_f, atol=5e-2), (ap_sim, ap_f)
    assert jnp.allclose(an_sim, an_f, atol=5e-2), (an_sim, an_f)

    print("KERNEL_OK")
</pallas_src>

<mosaic_0001>
module attributes {stable_mosaic.version = 11 : i64} {
  func.func @siamese_kernel(%arg0: i32, %arg1: i32, %arg2: memref<8x1024xf32, #tpu.memory_space<vmem>>, %arg3: memref<8x1024xf32, #tpu.memory_space<vmem>>, %arg4: memref<8x1024xf32, #tpu.memory_space<vmem>>, %arg5: memref<1024x128xbf16, #tpu.memory_space<vmem>>, %arg6: memref<1x128xf32, #tpu.memory_space<vmem>>, %arg7: memref<128x128xbf16, #tpu.memory_space<vmem>>, %arg8: memref<1x128xf32, #tpu.memory_space<vmem>>, %arg9: memref<8x2xf32, #tpu.memory_space<vmem>>, %arg10: memref<24x128xf32, #tpu.memory_space<vmem>>) attributes {dimension_semantics = [#tpu.dimension_semantics<parallel>, #tpu.dimension_semantics<arbitrary>], iteration_bounds = array<i64: 1, 1>, scalar_prefetch = 0 : i64, scratch_operands = 1 : i64, tpu.core_type = #tpu.core_type<tc>, window_params = [{transform_indices = @transform_0, window_bounds = array<i64: 8, 1024>}, {transform_indices = @transform_1, window_bounds = array<i64: 8, 1024>}, {transform_indices = @transform_2, window_bounds = array<i64: 8, 1024>}, {pipeline_mode = #tpu.pipeline_mode<synchronous>, transform_indices = @transform_3, window_bounds = array<i64: 1024, 128>}, {pipeline_mode = #tpu.pipeline_mode<synchronous>, transform_indices = @transform_4, window_bounds = array<i64: 1, 128>}, {pipeline_mode = #tpu.pipeline_mode<synchronous>, transform_indices = @transform_5, window_bounds = array<i64: 128, 128>}, {pipeline_mode = #tpu.pipeline_mode<synchronous>, transform_indices = @transform_6, window_bounds = array<i64: 1, 128>}, {transform_indices = @transform_7, window_bounds = array<i64: 8, 2>}]} {
    %c0_i32 = arith.constant 0 : i32
    %0 = arith.cmpi eq, %arg1, %c0_i32 : i32
    %1 = arith.extui %0 : i1 to i32
    %c0_i32_0 = arith.constant 0 : i32
    %2 = arith.cmpi ne, %1, %c0_i32_0 : i32
    scf.if %2 {
      %cst_22 = arith.constant 0.000000e+00 : f32
      %25 = vector.broadcast %cst_22 : f32 to vector<24x128xf32>
      %c0_23 = arith.constant 0 : index
      %c0_24 = arith.constant 0 : index
      %26 = vector.load %arg10[%c0_23, %c0_24] : memref<24x128xf32, #tpu.memory_space<vmem>>, vector<24x128xf32>
      tpu.vector_store %arg10[%c0_23, %c0_24], %25 {strides = array<i32>} : memref<24x128xf32, #tpu.memory_space<vmem>>, vector<24x128xf32>,
    } else {
    }
    %c0 = arith.constant 0 : index
    %c0_1 = arith.constant 0 : index
    %3 = vector.load %arg5[%c0, %c0_1] : memref<1024x128xbf16, #tpu.memory_space<vmem>>, vector<1024x128xbf16>
    %c0_2 = arith.constant 0 : index
    %c0_3 = arith.constant 0 : index
    %4 = vector.load %arg10[%c0_2, %c0_3] : memref<24x128xf32, #tpu.memory_space<vmem>>, vector<8x128xf32>
    %c0_4 = arith.constant 0 : index
    %c0_5 = arith.constant 0 : index
    %5 = vector.load %arg2[%c0_4, %c0_5] : memref<8x1024xf32, #tpu.memory_space<vmem>>, vector<8x1024xf32>
    %6 = arith.truncf %5 : vector<8x1024xf32> to vector<8x1024xbf16>
    %cst = arith.constant dense<0.000000e+00> : vector<8x128xf32>
    %7 = tpu.matmul %6, %3, %cst {dimension_numbers = #tpu.dot_dimension_numbers<[1], [0], [0], [1], [0, 0, 1, 1], [], []>} : vector<8x1024xbf16>, vector<1024x128xbf16>, vector<8x128xf32> -> vector<8x128xf32>
    %8 = arith.addf %4, %7 : vector<8x128xf32>
    %c0_6 = arith.constant 0 : index
    %c0_7 = arith.constant 0 : index
    %9 = vector.load %arg10[%c0_6, %c0_7] : memref<24x128xf32, #tpu.memory_space<vmem>>, vector<8x128xf32>
    tpu.vector_store %arg10[%c0_6, %c0_7], %8 {strides = array<i32>} : memref<24x128xf32, #tpu.memory_space<vmem>>, vector<8x128xf32>,
    %c8 = arith.constant 8 : index
    %c0_8 = arith.constant 0 : index
    %10 = vector.load %arg10[%c8, %c0_8] : memref<24x128xf32, #tpu.memory_space<vmem>>, vector<8x128xf32>
    %c0_9 = arith.constant 0 : index
    %c0_10 = arith.constant 0 : index
    %11 = vector.load %arg3[%c0_9, %c0_10] : memref<8x1024xf32, #tpu.memory_space<vmem>>, vector<8x1024xf32>
    %12 = arith.truncf %11 : vector<8x1024xf32> to vector<8x1024xbf16>
    %cst_11 = arith.constant dense<0.000000e+00> : vector<8x128xf32>
    %13 = tpu.matmul %12, %3, %cst_11 {dimension_numbers = #tpu.dot_dimension_numbers<[1], [0], [0], [1], [0, 0, 1, 1], [], []>} : vector<8x1024xbf16>, vector<1024x128xbf16>, vector<8x128xf32> -> vector<8x128xf32>
    %14 = arith.addf %10, %13 : vector<8x128xf32>
    %c8_12 = arith.constant 8 : index
    %c0_13 = arith.constant 0 : index
    %15 = vector.load %arg10[%c8_12, %c0_13] : memref<24x128xf32, #tpu.memory_space<vmem>>, vector<8x128xf32>
    tpu.vector_store %arg10[%c8_12, %c0_13], %14 {strides = array<i32>} : memref<24x128xf32, #tpu.memory_space<vmem>>, vector<8x128xf32>,
    %c16 = arith.constant 16 : index
    %c0_14 = arith.constant 0 : index
    %16 = vector.load %arg10[%c16, %c0_14] : memref<24x128xf32, #tpu.memory_space<vmem>>, vector<8x128xf32>
    %c0_15 = arith.constant 0 : index
    %c0_16 = arith.constant 0 : index
    %17 = vector.load %arg4[%c0_15, %c0_16] : memref<8x1024xf32, #tpu.memory_space<vmem>>, vector<8x1024xf32>
    %18 = arith.truncf %17 : vector<8x1024xf32> to vector<8x1024xbf16>
    %cst_17 = arith.constant dense<0.000000e+00> : vector<8x128xf32>
    %19 = tpu.matmul %18, %3, %cst_17 {dimension_numbers = #tpu.dot_dimension_numbers<[1], [0], [0], [1], [0, 0, 1, 1], [], []>} : vector<8x1024xbf16>, vector<1024x128xbf16>, vector<8x128xf32> -> vector<8x128xf32>
    %20 = arith.addf %16, %19 : vector<8x128xf32>
    %c16_18 = arith.constant 16 : index
    %c0_19 = arith.constant 0 : index
    %21 = vector.load %arg10[%c16_18, %c0_19] : memref<24x128xf32, #tpu.memory_space<vmem>>, vector<8x128xf32>
    tpu.vector_store %arg10[%c16_18, %c0_19], %20 {strides = array<i32>} : memref<24x128xf32, #tpu.memory_space<vmem>>, vector<8x128xf32>,
    %c0_i32_20 = arith.constant 0 : i32
    %22 = arith.cmpi eq, %arg1, %c0_i32_20 : i32
    %23 = arith.extui %22 : i1 to i32
    %c0_i32_21 = arith.constant 0 : i32
    %24 = arith.cmpi ne, %23, %c0_i32_21 : i32
    scf.if %24 {
      %c0_22 = arith.constant 0 : index
      %c0_23 = arith.constant 0 : index
      %25 = vector.load %arg10[%c0_22, %c0_23] : memref<24x128xf32, #tpu.memory_space<vmem>>, vector<24x128xf32>
      %c0_24 = arith.constant 0 : index
      %c0_25 = arith.constant 0 : index
      %26 = vector.load %arg6[%c0_24, %c0_25] : memref<1x128xf32, #tpu.memory_space<vmem>>, vector<1x128xf32>
      %27 = vector.broadcast %26 : vector<1x128xf32> to vector<24x128xf32>
      %28 = arith.addf %25, %27 : vector<24x128xf32>
      %cst_26 = arith.constant 0.000000e+00 : f32
      %29 = vector.broadcast %cst_26 : f32 to vector<24x128xf32>
      %30 = arith.maximumf %28, %29 : vector<24x128xf32>
      %31 = arith.truncf %30 : vector<24x128xf32> to vector<24x128xbf16>
      %c0_27 = arith.constant 0 : index
      %c0_28 = arith.constant 0 : index
      %32 = vector.load %arg7[%c0_27, %c0_28] : memref<128x128xbf16, #tpu.memory_space<vmem>>, vector<128x128xbf16>
      %cst_29 = arith.constant dense<0.000000e+00> : vector<24x128xf32>
      %33 = tpu.matmul %31, %32, %cst_29 {dimension_numbers = #tpu.dot_dimension_numbers<[1], [0], [0], [1], [0, 0, 1, 1], [], []>} : vector<24x128xbf16>, vector<128x128xbf16>, vector<24x128xf32> -> vector<24x128xf32>
      %c0_30 = arith.constant 0 : index
      %c0_31 = arith.constant 0 : index
      %34 = vector.load %arg8[%c0_30, %c0_31] : memref<1x128xf32, #tpu.memory_space<vmem>>, vector<1x128xf32>
      %35 = vector.broadcast %34 : vector<1x128xf32> to vector<24x128xf32>
      %36 = arith.addf %33, %35 : vector<24x128xf32>
      %37 = vector.extract_strided_slice %36 {offsets = [0, 0], sizes = [8, 128], strides = [1, 1]} : vector<24x128xf32> to vector<8x128xf32>
      %38 = vector.extract_strided_slice %36 {offsets = [8, 0], sizes = [8, 128], strides = [1, 1]} : vector<24x128xf32> to vector<8x128xf32>
      %39 = vector.extract_strided_slice %36 {offsets = [16, 0], sizes = [8, 128], strides = [1, 1]} : vector<24x128xf32> to vector<8x128xf32>
      %40 = arith.mulf %37, %37 : vector<8x128xf32>
      %cst_32 = arith.constant dense<0.000000e+00> : vector<8xf32>
      %41 = vector.multi_reduction <add>, %40, %cst_32 [1] : vector<8x128xf32> to vector<8xf32>
      %42 = vector.shape_cast %41 : vector<8xf32> to vector<8x1xf32>
      %43 = arith.mulf %38, %38 : vector<8x128xf32>
      %cst_33 = arith.constant dense<0.000000e+00> : vector<8xf32>
      %44 = vector.multi_reduction <add>, %43, %cst_33 [1] : vector<8x128xf32> to vector<8xf32>
      %45 = vector.shape_cast %44 : vector<8xf32> to vector<8x1xf32>
      %46 = arith.mulf %39, %39 : vector<8x128xf32>
      %cst_34 = arith.constant dense<0.000000e+00> : vector<8xf32>
      %47 = vector.multi_reduction <add>, %46, %cst_34 [1] : vector<8x128xf32> to vector<8xf32>
      %48 = vector.shape_cast %47 : vector<8xf32> to vector<8x1xf32>
      %49 = arith.mulf %37, %38 : vector<8x128xf32>
      %cst_35 = arith.constant dense<0.000000e+00> : vector<8xf32>
      %50 = vector.multi_reduction <add>, %49, %cst_35 [1] : vector<8x128xf32> to vector<8xf32>
      %51 = vector.shape_cast %50 : vector<8xf32> to vector<8x1xf32>
      %52 = arith.mulf %37, %39 : vector<8x128xf32>
      %cst_36 = arith.constant dense<0.000000e+00> : vector<8xf32>
      %53 = vector.multi_reduction <add>, %52, %cst_36 [1] : vector<8x128xf32> to vector<8xf32>
      %54 = vector.shape_cast %53 : vector<8xf32> to vector<8x1xf32>
      %55 = arith.mulf %42, %45 : vector<8x1xf32>
      %cst_37 = arith.constant 1.000000e-16 : f32
      %56 = vector.broadcast %cst_37 : f32 to vector<8x1xf32>
      %57 = arith.maximumf %55, %56 : vector<8x1xf32>
      %58 = math.rsqrt %57 : vector<8x1xf32>
      %59 = arith.mulf %51, %58 : vector<8x1xf32>
      %60 = arith.mulf %42, %48 : vector<8x1xf32>
      %cst_38 = arith.constant 1.000000e-16 : f32
      %61 = vector.broadcast %cst_38 : f32 to vector<8x1xf32>
      %62 = arith.maximumf %60, %61 : vector<8x1xf32>
      %63 = math.rsqrt %62 : vector<8x1xf32>
      %64 = arith.mulf %54, %63 : vector<8x1xf32>
      %65 = tpu.concatenate %59, %64 in 1 : vector<8x1xf32>, vector<8x1xf32> -> vector<8x2xf32>
      %c0_39 = arith.constant 0 : index
      %c0_40 = arith.constant 0 : index
      %66 = vector.load %arg9[%c0_39, %c0_40] : memref<8x2xf32, #tpu.memory_space<vmem>>, vector<8x2xf32>
      tpu.vector_store %arg9[%c0_39, %c0_40], %65 {strides = array<i32>} : memref<8x2xf32, #tpu.memory_space<vmem>>, vector<8x2xf32>,
    } else {
    }
    return
  }
  func.func @transform_0(%arg0: i32, %arg1: i32) -> (i32, i32) {
    %c0_i32 = arith.constant 0 : i32
    return %arg0, %arg1 : i32, i32
  }
  func.func @transform_1(%arg0: i32, %arg1: i32) -> (i32, i32) {
    %c0_i32 = arith.constant 0 : i32
    return %arg0, %arg1 : i32, i32
  }
  func.func @transform_2(%arg0: i32, %arg1: i32) -> (i32, i32) {
    %c0_i32 = arith.constant 0 : i32
    return %arg0, %arg1 : i32, i32
  }
  func.func @transform_3(%arg0: i32, %arg1: i32) -> (i32, i32) {
    %c0_i32 = arith.constant 0 : i32
    %c0_i32_0 = arith.constant 0 : i32
    %c0_i32_1 = arith.constant 0 : i32
    return %c0_i32, %c0_i32_0 : i32, i32
  }
  func.func @transform_4(%arg0: i32, %arg1: i32) -> (i32, i32) {
    %c0_i32 = arith.constant 0 : i32
    %c0_i32_0 = arith.constant 0 : i32
    %c0_i32_1 = arith.constant 0 : i32
    return %c0_i32, %c0_i32_0 : i32, i32
  }
  func.func @transform_5(%arg0: i32, %arg1: i32) -> (i32, i32) {
    %c0_i32 = arith.constant 0 : i32
    %c0_i32_0 = arith.constant 0 : i32
    %c0_i32_1 = arith.constant 0 : i32
    return %c0_i32, %c0_i32_0 : i32, i32
  }
  func.func @transform_6(%arg0: i32, %arg1: i32) -> (i32, i32) {
    %c0_i32 = arith.constant 0 : i32
    %c0_i32_0 = arith.constant 0 : i32
    %c0_i32_1 = arith.constant 0 : i32
    return %c0_i32, %c0_i32_0 : i32, i32
  }
  func.func @transform_7(%arg0: i32, %arg1: i32) -> (i32, i32) {
    %c0_i32 = arith.constant 0 : i32
    %c0_i32_0 = arith.constant 0 : i32
    return %arg0, %c0_i32 : i32, i32
  }
}

</mosaic_0001>

<bundles_post_ra>
// kernel: tpu_custom_call.1
= control target key start
LH: loop header
LB: loop body
LE: loop exit
PB: predicated region body
PF: predicated region fallthrough
CT: control target
= control target key end

     0   :  { %12 = vsyncpa [#allocation4], 0  ;;  %s2335_s0 = inlined_call_operand.hbm [shape: f32[8,1024], index: 0, kind: input, shape index: {}]   ;;  %s2336_s1 = inlined_call_operand.hbm [shape: f32[8,1024], index: 1, kind: input, shape index: {}]   ;;  %s2337_s2 = inlined_call_operand.hbm [shape: f32[8,1024], index: 2, kind: input, shape index: {}]   ;;  %s2338_s3 = inlined_call_operand.hbm [shape: bf16[1024,128], index: 3, kind: input, shape index: {}]   ;;  %s2339_s4 = inlined_call_operand.vmem [shape: f32[1,128], index: 4, kind: input, shape index: {}]   ;;  %s2340_s5 = inlined_call_operand.hbm [shape: bf16[128,128], index: 5, kind: input, shape index: {}]   ;;  %s2341_s6 = inlined_call_operand.vmem [shape: f32[1,128], index: 6, kind: input, shape index: {}]   ;;  %s2342_s7 = inlined_call_operand.vmem [shape: f32[8,2], index: 7, kind: output, shape index: {}]  }
   0x1   :  { %13 = vsyncpa [#allocation6], 0 }
   0x2   :  { %14 = vsyncpa [#allocation9], 0  ;;  %s1886_s24 = smov [#allocation5]   ;;  %s1887_s26 = smov [#allocation8]  }
   0x3   :  { %s31_s25 = sshll.u32 %s1886_s24, 4  ;;  %s50_s27 = sshll.u32 %s1887_s26, 4  ;;  %s32_s25 = int_to_ptr.vmem [resolvable:$true] %s31_s25  ;;  %s1933_s27 = int_to_ptr.vmem [resolvable:$true] %s50_s27 }
   0x4   :  { %s1770_s30 = scalar_lea.hbm %s2336_s1, 1024 }
   0x5   :  { %p1771_p0 = scmp.ne.s32.totalorder %s2336_s1, %s1770_s30  ;;  %p1774_p1 = scmp.lt.u32.totalorder %s1770_s30, %s2336_s1 }
   0x7   :  { %p1776_p2 = pnand %p1774_p1, %p1771_p0 }
   0x9   :  { %1779 = shalt.err (!%p1776_p2)
}
   0xa   :  { %s1780_s12 = scalar_lea.vmem %s32_s25, 1024  ;;  %p1785_p4 = scmp.lt.s32.totalorder %s32_s25, %s32_s25 }
   0xb   :  { %p1781_p3 = scmp.ne.s32.totalorder %s32_s25, %s1780_s12  ;;  %p1786_p5 = scmp.lt.s32.totalorder %s1780_s12, %s1780_s12 }
   0xd   :  { %p1787_p6 = por %p1786_p5, %p1785_p4 }
   0xf   :  { %p1788_p7 = pnand %p1787_p6, %p1781_p3 }
  0x11   :  { %1791 = shalt.err (!%p1788_p7)
}
  0x12   :  { %34 = dma.hbm_to_vmem [thread:$0]  %s2336_s1, 1024, %s32_s25, [#allocation6]  }
  0x13   :  { %s1792_s17 = scalar_lea.hbm %s2338_s3, 8192 }
  0x14   :  { %p1793_p8 = scmp.ne.s32.totalorder %s2338_s3, %s1792_s17  ;;  %p1796_p9 = scmp.lt.u32.totalorder %s1792_s17, %s2338_s3 }
  0x16   :  { %p1798_p10 = pnand %p1796_p9, %p1793_p8 }
  0x18   :  { %1801 = shalt.err (!%p1798_p10)
}
  0x19   :  { %s1802_s22 = scalar_lea.vmem %s1933_s27, 8192  ;;  %p1807_p12 = scmp.lt.s32.totalorder %s1933_s27, %s1933_s27 }
  0x1a   :  { %p1803_p11 = scmp.ne.s32.totalorder %s1933_s27, %s1802_s22  ;;  %p1808_p13 = scmp.lt.s32.totalorder %s1802_s22, %s1802_s22 }
  0x1c   :  { %p1809_p0 = por %p1808_p13, %p1807_p12 }
  0x1e   :  { %p1810_p1 = pnand %p1809_p0, %p1803_p11 }
  0x20   :  { %1813 = shalt.err (!%p1810_p1)
}
  0x21   :  { %s1888_s1 = smov 64   ;;  %s1889_s23 = smov 4  }
  0x22   :  { %56 = dma.hbm_to_vmem [thread:$0]  %s2338_s3, 8192, %s1933_s27, [#allocation9], %s1888_s1, %s1888_s1, %s1889_s23  }
  0x23   :  { %s1890_s26 = smov [#allocation3]   ;;  %s1891_s29 = smov [#allocation7]  }
  0x24   :  { %s21_s28 = sshll.u32 %s1890_s26, 4  ;;  %s41_s30 = sshll.u32 %s1891_s29, 4  ;;  %s22_s28 = int_to_ptr.vmem [resolvable:$true] %s21_s28  ;;  %s42_s30 = int_to_ptr.vmem [resolvable:$true] %s41_s30 }
  0x25   :  { %s1814_s10 = scalar_lea.hbm %s2335_s0, 1024 }
  0x26   :  { %p1815_p2 = scmp.ne.s32.totalorder %s2335_s0, %s1814_s10  ;;  %p1818_p3 = scmp.lt.u32.totalorder %s1814_s10, %s2335_s0 }
  0x28   :  { %p1820_p4 = pnand %p1818_p3, %p1815_p2 }
  0x2a   :  { %1823 = shalt.err (!%p1820_p4)
}
  0x2b   :  { %s1824_s3 = scalar_lea.vmem %s22_s28, 1024  ;;  %p1829_p6 = scmp.lt.s32.totalorder %s22_s28, %s22_s28 }
  0x2c   :  { %p1825_p5 = scmp.ne.s32.totalorder %s22_s28, %s1824_s3  ;;  %p1830_p7 = scmp.lt.s32.totalorder %s1824_s3, %s1824_s3 }
  0x2e   :  { %p1831_p8 = por %p1830_p7, %p1829_p6 }
  0x30   :  { %p1832_p9 = pnand %p1831_p8, %p1825_p5 }
  0x32   :  { %1835 = shalt.err (!%p1832_p9)
}
  0x33   :  { %24 = dma.hbm_to_vmem [thread:$0]  %s2335_s0, 1024, %s22_s28, [#allocation4]  }
  0x34   :  { %s1836_s18 = scalar_lea.hbm %s2337_s2, 1024 }
  0x35   :  { %p1837_p10 = scmp.ne.s32.totalorder %s2337_s2, %s1836_s18  ;;  %p1840_p11 = scmp.lt.u32.totalorder %s1836_s18, %s2337_s2 }
  0x37   :  { %p1842_p12 = pnand %p1840_p11, %p1837_p10 }
  0x39   :  { %1845 = shalt.err (!%p1842_p12)
}
  0x3a   :  { %s1846_s24 = scalar_lea.vmem %s42_s30, 1024  ;;  %p1851_p0 = scmp.lt.s32.totalorder %s42_s30, %s42_s30 }
  0x3b   :  { %p1847_p13 = scmp.ne.s32.totalorder %s42_s30, %s1846_s24  ;;  %p1852_p1 = scmp.lt.s32.totalorder %s1846_s24, %s1846_s24 }
  0x3d   :  { %p1853_p2 = por %p1852_p1, %p1851_p0 }
  0x3f   :  { %p1854_p3 = pnand %p1853_p2, %p1847_p13 }
  0x41   :  { %1857 = shalt.err (!%p1854_p3)
}
  0x42   :  { %44 = dma.hbm_to_vmem [thread:$0]  %s2337_s2, 1024, %s42_s30, [#allocation6]  }
  0x43   :  { %s1892_s26 = smov [#allocation10]   ;;  %s1858_s9 = scalar_lea.hbm %s2340_s5, 1024 }
  0x44   :  { %s64_s28 = sshll.u32 %s1892_s26, 4  ;;  %p1859_p4 = scmp.ne.s32.totalorder %s2340_s5, %s1858_s9  ;;  %s65_s28 = int_to_ptr.vmem [resolvable:$true] %s64_s28 }
  0x45   :  { %p1862_p5 = scmp.lt.u32.totalorder %s1858_s9, %s2340_s5 }
  0x47   :  { %p1864_p6 = pnand %p1862_p5, %p1859_p4 }
  0x49   :  { %1867 = shalt.err (!%p1864_p6)
}
  0x4a   :  { %s1868_s14 = scalar_lea.vmem %s65_s28, 1024  ;;  %p1873_p8 = scmp.lt.s32.totalorder %s65_s28, %s65_s28 }
  0x4b   :  { %p1869_p7 = scmp.ne.s32.totalorder %s65_s28, %s1868_s14  ;;  %p1874_p9 = scmp.lt.s32.totalorder %s1868_s14, %s1868_s14 }
  0x4d   :  { %p1875_p10 = por %p1874_p9, %p1873_p8 }
  0x4f   :  { %p1876_p11 = pnand %p1875_p10, %p1869_p7 }
  0x51   :  { %1879 = shalt.err (!%p1876_p11)
}
  0x52   :  { %70 = dma.hbm_to_vmem [thread:$0]  %s2340_s5, 1024, %s65_s28, [#allocation9], %s1888_s1, %s1888_s1, %s1889_s23  }
  0x53   :  { %1880 = dma.done.wait [#allocation4], 1024  }
  0x54   :  { %1881 = vsyncadd [#allocation4], 4294966272 }
  0x55   :  { %1882 = dma.done.wait [#allocation6], 2048  }
  0x56   :  { %1883 = vsyncadd [#allocation6], 4294965248 }
  0x57   :  { %1884 = dma.done.wait [#allocation9], 9216  }
  0x58   :  { %1885 = vsyncadd [#allocation9], 4294958080  ;;  %v2006_v0 = vld [vmem:[#allocation8 + $0x40] sm:$0xff]   ;;  %v2017_v4 = vld [vmem:[#allocation8 + $0x48] sm:$0xff]   ;;  %vm1308_vm0 = vcmask 7168   ;;  %vm1310_vm1 = vcmask 15360  }
  0x59   :  { %v2008_v1 = vld [vmem:[#allocation8 + $0xc0] sm:$0xff]   ;;  %1393 = vmatprep.subr.bf16.mxu0 %v2006_v0  ;;  %v2020_v5 = vld [vmem:[#allocation8 + $0xc8] sm:$0xff]   ;;  %v2029_v8 = vld [vmem:[#allocation8 + $0x50] sm:$0xff]  }
  0x5a   :  { %v2011_v2 = vld [vmem:[#allocation8] sm:$0xff]   ;;  %1415 = vmatprep.subr.bf16.mxu1 %v2008_v1  ;;  %v2023_v6 = vld [vmem:[#allocation8 + $0x8] sm:$0xff]   ;;  %v2032_v9 = vld [vmem:[#allocation8 + $0xd0] sm:$0xff]  }
  0x5b   :  { %v2014_v3 = vld [vmem:[#allocation8 + $0x80] sm:$0xff]   ;;  %1394 = vmatpush3.bf16.msra.mxu0 %v2011_v2  ;;  %v2026_v7 = vld [vmem:[#allocation8 + $0x88] sm:$0xff]   ;;  %v2035_v10 = vld [vmem:[#allocation8 + $0x10] sm:$0xff]  }
  0x5c   :  { %1416 = vmatpush3.bf16.msra.mxu1 %v2014_v3  ;;  %1395 = vmatprep.subr.bf16.mxu0 %v2017_v4  ;;  %v2038_v11 = vld [vmem:[#allocation8 + $0x90] sm:$0xff]   ;;  %v2041_v12 = vld [vmem:[#allocation8 + $0x58] sm:$0xff]   ;;  %v2053_v16 = vld [vmem:[#allocation8 + $0x60] sm:$0xff]  }
  0x5d   :  { %1417 = vmatprep.subr.bf16.mxu1 %v2020_v5  ;;  %v2044_v13 = vld [vmem:[#allocation8 + $0xd8] sm:$0xff]   ;;  %v2056_v17 = vld [vmem:[#allocation8 + $0xe0] sm:$0xff]   ;;  %v2065_v20 = vld [vmem:[#allocation8 + $0x68] sm:$0xff]  }
  0x5e   :  { %v2047_v14 = vld [vmem:[#allocation8 + $0x18] sm:$0xff]   ;;  %v2059_v18 = vld [vmem:[#allocation8 + $0x20] sm:$0xff]   ;;  %v2068_v21 = vld [vmem:[#allocation8 + $0xe8] sm:$0xff]  }
  0x5f   :  { %1396 = vmatpush3.bf16.msra.mxu0 %v2023_v6  ;;  %v2050_v15 = vld [vmem:[#allocation8 + $0x98] sm:$0xff]   ;;  %v2062_v19 = vld [vmem:[#allocation8 + $0xa0] sm:$0xff]   ;;  %v2071_v22 = vld [vmem:[#allocation8 + $0x28] sm:$0xff]  }
  0x60   :  { %1418 = vmatpush3.bf16.msra.mxu1 %v2026_v7  ;;  %1397 = vmatprep.subr.bf16.mxu0 %v2029_v8  ;;  %v2074_v23 = vld [vmem:[#allocation8 + $0xa8] sm:$0xff]   ;;  %v2077_v24 = vld [vmem:[#allocation8 + $0x70] sm:$0xff]   ;;  %v2089_v28 = vld [vmem:[#allocation8 + $0x78] sm:$0xff]  }
  0x61   :  { %1419 = vmatprep.subr.bf16.mxu1 %v2032_v9  ;;  %v2080_v25 = vld [vmem:[#allocation8 + $0xf0] sm:$0xff]   ;;  %v2092_v29 = vld [vmem:[#allocation8 + $0xf8] sm:$0xff]   ;;  %v226_v32 = vld [vmem:[#allocation3 + $0x8] sm:$0xff] }
  0x62   :  { %v2083_v26 = vld [vmem:[#allocation8 + $0x30] sm:$0xff]   ;;  %v2095_v30 = vld [vmem:[#allocation8 + $0x38] sm:$0xff]   ;;  %v225_v34 = vld [vmem:[#allocation3] sm:$0xff]  ;;  %v234_v35 = vpack.c.bf16 %v226_v32, %v226_v32 }
  0x63   :  { %1398 = vmatpush3.bf16.msra.mxu0 %v2035_v10  ;;  %v2086_v27 = vld [vmem:[#allocation8 + $0xb0] sm:$0xff]   ;;  %v2098_v31 = vld [vmem:[#allocation8 + $0xb8] sm:$0xff]   ;;  %v233_v37 = vpack.c.bf16 %v225_v34, %v225_v34  ;;  %v2102_v40 = vld [vmem:[#allocation8 + $0x140] sm:$0xff]  }
  0x64   :  { %1420 = vmatpush3.bf16.msra.mxu1 %v2038_v11  ;;  %1399 = vmatprep.subr.bf16.mxu0 %v2041_v12  ;;  %v228_v33 = vld [vmem:[#allocation3 + $0x18] sm:$0xff]  ;;  %v227_v38 = vld [vmem:[#allocation3 + $0x10] sm:$0xff]  ;;  %v2104_v41 = vld [vmem:[#allocation8 + $0x1c0] sm:$0xff]  }
  0x65   :  { %1421 = vmatprep.subr.bf16.mxu1 %v2044_v13  ;;  %v236_v36 = vpack.c.bf16 %v228_v33, %v228_v33  ;;  %v235_v39 = vpack.c.bf16 %v227_v38, %v227_v38  ;;  %657 = vmatprep.mubr.bf16.mxu0 %v234_v35  ;;  %v2106_v42 = vld [vmem:[#allocation8 + $0x100] sm:$0xff]   ;;  %v2113_v44 = vld [vmem:[#allocation8 + $0x148] sm:$0xff]   ;;  %v2125_v48 = vld [vmem:[#allocation8 + $0x150] sm:$0xff]  }
  0x66   :  { %v2110_v43 = vld [vmem:[#allocation8 + $0x180] sm:$0xff]   ;;  %v2116_v45 = vld [vmem:[#allocation8 + $0x1c8] sm:$0xff]   ;;  %v2128_v49 = vld [vmem:[#allocation8 + $0x1d0] sm:$0xff]  }
  0x67   :  { %1400 = vmatpush3.bf16.msra.mxu0 %v2047_v14  ;;  %697 = vmatprep.mubr.bf16.mxu1 %v236_v36  ;;  %v2119_v46 = vld [vmem:[#allocation8 + $0x108] sm:$0xff]   ;;  %v2131_v50 = vld [vmem:[#allocation8 + $0x110] sm:$0xff]   ;;  %v2137_v52 = vld [vmem:[#allocation8 + $0x158] sm:$0xff]  }
  0x68   :  { %1422 = vmatpush3.bf16.msra.mxu1 %v2050_v15  ;;  %1401 = vmatprep.subr.bf16.mxu0 %v2053_v16  ;;  %v2122_v47 = vld [vmem:[#allocation8 + $0x188] sm:$0xff]   ;;  %v2134_v51 = vld [vmem:[#allocation8 + $0x190] sm:$0xff]   ;;  %v2140_v53 = vld [vmem:[#allocation8 + $0x1d8] sm:$0xff]  }
  0x69   :  { %1423 = vmatprep.subr.bf16.mxu1 %v2056_v17  ;;  %v2143_v54 = vld [vmem:[#allocation8 + $0x118] sm:$0xff]   ;;  %v2149_v56 = vld [vmem:[#allocation8 + $0x160] sm:$0xff]   ;;  %v2161_v60 = vld [vmem:[#allocation8 + $0x168] sm:$0xff]  }
  0x6a   :  { %v2146_v55 = vld [vmem:[#allocation8 + $0x198] sm:$0xff]   ;;  %v2152_v57 = vld [vmem:[#allocation8 + $0x1e0] sm:$0xff]   ;;  %2369 = vst [vmem:[#allocation16_spill] sm:$0xff] %v2161_v60  ;;  %v2164_v61 = vld [vmem:[#allocation8 + $0x1e8] sm:$0xff]  }
  0x6b   :  { %1402 = vmatpush3.bf16.msra.mxu0 %v2059_v18  ;;  %v2155_v58 = vld [vmem:[#allocation8 + $0x120] sm:$0xff]   ;;  %2370 = vst [vmem:[#allocation17_spill] sm:$0xff] %v2164_v61  ;;  %v2167_v62 = vld [vmem:[#allocation8 + $0x128] sm:$0xff]   ;;  %v2173_v32 = vld [vmem:[#allocation8 + $0x170] sm:$0xff]  }
  0x6c   :  { %1424 = vmatpush3.bf16.msra.mxu1 %v2062_v19  ;;  %1403 = vmatprep.subr.bf16.mxu0 %v2065_v20  ;;  %2367 = vst [vmem:[#allocation14_spill] sm:$0xff] %v2155_v58  ;;  %v2158_v59 = vld [vmem:[#allocation8 + $0x1a0] sm:$0xff]   ;;  %2371 = vst [vmem:[#allocation18_spill] sm:$0xff] %v2167_v62  ;;  %v2170_v63 = vld [vmem:[#allocation8 + $0x1a8] sm:$0xff]  }
  0x6d   :  { %1425 = vmatprep.subr.bf16.mxu1 %v2068_v21  ;;  %2368 = vst [vmem:[#allocation15_spill] sm:$0xff] %v2158_v59  ;;  %2372 = vst [vmem:[#allocation19_spill] sm:$0xff] %v2170_v63  ;;  %v2176_v33 = vld [vmem:[#allocation8 + $0x1f0] sm:$0xff]   ;;  %v2185_v36 = vld [vmem:[#allocation8 + $0x178] sm:$0xff]  }
  0x6e   :  { %2373 = vst [vmem:[#allocation20_spill] sm:$0xff] %v2173_v32  ;;  %2374 = vst [vmem:[#allocation21_spill] sm:$0xff] %v2176_v33  ;;  %v2179_v34 = vld [vmem:[#allocation8 + $0x130] sm:$0xff]   ;;  %v2191_v38 = vld [vmem:[#allocation8 + $0x138] sm:$0xff]  }
  0x6f   :  { %1404 = vmatpush3.bf16.msra.mxu0 %v2071_v22  ;;  %2375 = vst [vmem:[#allocation22_spill] sm:$0xff] %v2179_v34  ;;  %v2182_v35 = vld [vmem:[#allocation8 + $0x1b0] sm:$0xff]   ;;  %2377 = vst [vmem:[#allocation24_spill] sm:$0xff] %v2185_v36 }
  0x70   :  { %1426 = vmatpush3.bf16.msra.mxu1 %v2074_v23  ;;  %1405 = vmatprep.subr.bf16.mxu0 %v2077_v24  ;;  %2376 = vst [vmem:[#allocation23_spill] sm:$0xff] %v2182_v35 }
  0x71   :  { %1427 = vmatprep.subr.bf16.mxu1 %v2080_v25 }
  0x73   :  { %1406 = vmatpush3.bf16.msra.mxu0 %v2083_v26 }
  0x74   :  { %1428 = vmatpush3.bf16.msra.mxu1 %v2086_v27  ;;  %1407 = vmatprep.subr.bf16.mxu0 %v2089_v28 }
  0x75   :  { %1429 = vmatprep.subr.bf16.mxu1 %v2092_v29 }
  0x77   :  { %1408 = vmatpush3.bf16.msra.mxu0 %v2095_v30 }
  0x78   :  { %1430 = vmatpush3.bf16.msra.mxu1 %v2098_v31  ;;  %1437 = vmatprep.subr.bf16.mxu0 %v2102_v40 }
  0x79   :  { %1459 = vmatprep.subr.bf16.mxu1 %v2104_v41 }
  0x7a   :  { %658 = vmatmul.mubr.bf16.vlgmr.msra.gmra.mrb[0].mxu0 %v233_v37  ;;  %v2188_v37 = vld [vmem:[#allocation8 + $0x1f8] sm:$0xff]  }
  0x7b   :  { %698 = vmatmul.mubr.bf16.vlgmr.msra.gmra.mrb[0].mxu1 %v235_v39  ;;  %1438 = vmatpush3.bf16.msra.mxu0 %v2106_v42  ;;  %2378 = vst [vmem:[#allocation25_spill] sm:$0xff] %v2188_v37  ;;  %v2194_v39 = vld [vmem:[#allocation8 + $0x1b8] sm:$0xff]  }
  0x7c   :  { %1460 = vmatpush3.bf16.msra.mxu1 %v2110_v43  ;;  %1439 = vmatprep.subr.bf16.mxu0 %v2113_v44 }
  0x7d   :  { %1461 = vmatprep.subr.bf16.mxu1 %v2116_v45 }
  0x7f   :  { %1440 = vmatpush3.bf16.msra.mxu0 %v2119_v46 }
  0x80   :  { %1462 = vmatpush3.bf16.msra.mxu1 %v2122_v47  ;;  %1441 = vmatprep.subr.bf16.mxu0 %v2125_v48 }
  0x81   :  { %1463 = vmatprep.subr.bf16.mxu1 %v2128_v49 }
  0x83   :  { %1442 = vmatpush3.bf16.msra.mxu0 %v2131_v50 }
  0x84   :  { %1464 = vmatpush3.bf16.msra.mxu1 %v2134_v51  ;;  %1443 = vmatprep.subr.bf16.mxu0 %v2137_v52 }
  0x85   :  { %1465 = vmatprep.subr.bf16.mxu1 %v2140_v53 }
  0x87   :  { %1444 = vmatpush3.bf16.msra.mxu0 %v2143_v54 }
  0x88   :  { %1466 = vmatpush3.bf16.msra.mxu1 %v2146_v55  ;;  %1445 = vmatprep.subr.bf16.mxu0 %v2149_v56 }
  0x89   :  { %1467 = vmatprep.subr.bf16.mxu1 %v2152_v57 }
  0x8b   :  { %1446 = vmatpush3.bf16.msra.mxu0 %v2155_v58 }
  0x8c   :  { %1468 = vmatpush3.bf16.msra.mxu1 %v2158_v59  ;;  %1447 = vmatprep.subr.bf16.mxu0 %v2161_v60  ;;  %v789_v60 = vld [vmem:[#allocation5 + $0x8] sm:$0xff] }
  0x8d   :  { %1469 = vmatprep.subr.bf16.mxu1 %v2164_v61  ;;  %v231_v61 = vld [vmem:[#allocation3 + $0x30] sm:$0xff] }
  0x8e   :  { %v239_v59 = vpack.c.bf16 %v231_v61, %v231_v61  ;;  %v793_v61 = vld [vmem:[#allocation5 + $0x28] sm:$0xff] }
  0x8f   :  { %1448 = vmatpush3.bf16.msra.mxu0 %v2167_v62  ;;  %v229_v62 = vld [vmem:[#allocation3 + $0x20] sm:$0xff] }
  0x90   :  { %1470 = vmatpush3.bf16.msra.mxu1 %v2170_v63  ;;  %1449 = vmatprep.subr.bf16.mxu0 %v2173_v32  ;;  %v230_v32 = vld [vmem:[#allocation3 + $0x28] sm:$0xff] }
  0x91   :  { %1471 = vmatprep.subr.bf16.mxu1 %v2176_v33  ;;  %v232_v33 = vld [vmem:[#allocation3 + $0x38] sm:$0xff]  ;;  %v238_v63 = vpack.c.bf16 %v230_v32, %v230_v32  ;;  %v801_v32 = vpack.c.bf16 %v793_v61, %v793_v61 }
  0x92   :  { %v2386_v61 = vld [vmem:[#allocation21_spill] sm:$0xff] }
  0x93   :  { %1450 = vmatpush3.bf16.msra.mxu0 %v2179_v34  ;;  %v240_v34 = vpack.c.bf16 %v232_v33, %v232_v33  ;;  %737 = vmatprep.mubr.bf16.mxu0 %v238_v63  ;;  %v795_v63 = vld [vmem:[#allocation5 + $0x38] sm:$0xff] }
  0x94   :  { %1472 = vmatpush3.bf16.msra.mxu1 %v2182_v35  ;;  %1451 = vmatprep.subr.bf16.mxu0 %v2185_v36  ;;  %v237_v35 = vpack.c.bf16 %v229_v62, %v229_v62  ;;  %v791_v36 = vld [vmem:[#allocation5 + $0x18] sm:$0xff]  ;;  %v803_v33 = vpack.c.bf16 %v795_v63, %v795_v63  ;;  %v792_v63 = vld [vmem:[#allocation5 + $0x20] sm:$0xff] }
  0x95   :  { %1473 = vmatprep.subr.bf16.mxu1 %v2188_v37  ;;  %777 = vmatprep.mubr.bf16.mxu1 %v240_v34  ;;  %v797_v37 = vpack.c.bf16 %v789_v60, %v789_v60  ;;  %v799_v58 = vpack.c.bf16 %v791_v36, %v791_v36  ;;  %v2379_v34 = vld [vmem:[#allocation14_spill] sm:$0xff]  ;;  %v2381_v36 = vld [vmem:[#allocation16_spill] sm:$0xff] }
  0x97   :  { %1452 = vmatpush3.bf16.msra.mxu0 %v2191_v38 }
  0x98   :  { %1474 = vmatpush3.bf16.msra.mxu1 %v2194_v39  ;;  %1481 = vmatprep.subr.bf16.mxu0 %v2006_v0 }
  0x99   :  { %1503 = vmatprep.subr.bf16.mxu1 %v2008_v1 }
  0x9a   :  { %738 = vmatmul.mubr.bf16.vlgmr.msra.gmra.mrb[4].mxu0 %v237_v35  ;;  %v2380_v35 = vld [vmem:[#allocation15_spill] sm:$0xff] }
  0x9b   :  { %778 = vmatmul.mubr.bf16.vlgmr.msra.gmra.mrb[4].mxu1 %v239_v59  ;;  %1482 = vmatpush3.bf16.msra.mxu0 %v2011_v2  ;;  %v790_v59 = vld [vmem:[#allocation5 + $0x10] sm:$0xff] }
  0x9c   :  { %1504 = vmatpush3.bf16.msra.mxu1 %v2014_v3  ;;  %1483 = vmatprep.subr.bf16.mxu0 %v2017_v4  ;;  %v798_v62 = vpack.c.bf16 %v790_v59, %v790_v59  ;;  %v2384_v59 = vld [vmem:[#allocation19_spill] sm:$0xff] }
  0x9d   :  { %1505 = vmatprep.subr.bf16.mxu1 %v2020_v5  ;;  %836 = vmatprep.mubr.bf16.mxu0 %v797_v37  ;;  %v2382_v37 = vld [vmem:[#allocation17_spill] sm:$0xff] }
  0x9e   :  { %876 = vmatprep.mubr.bf16.mxu1 %v799_v58  ;;  %v788_v58 = vld [vmem:[#allocation5] sm:$0xff] }
  0x9f   :  { %1484 = vmatpush3.bf16.msra.mxu0 %v2023_v6  ;;  %v796_v60 = vpack.c.bf16 %v788_v58, %v788_v58  ;;  %v2383_v58 = vld [vmem:[#allocation18_spill] sm:$0xff] }
  0xa0   :  { %1506 = vmatpush3.bf16.msra.mxu1 %v2026_v7  ;;  %1485 = vmatprep.subr.bf16.mxu0 %v2029_v8 }
  0xa1   :  { %1507 = vmatprep.subr.bf16.mxu1 %v2032_v9 }
  0xa3   :  { %1486 = vmatpush3.bf16.msra.mxu0 %v2035_v10 }
  0xa4   :  { %1508 = vmatpush3.bf16.msra.mxu1 %v2038_v11  ;;  %1487 = vmatprep.subr.bf16.mxu0 %v2041_v12 }
  0xa5   :  { %1509 = vmatprep.subr.bf16.mxu1 %v2044_v13 }
  0xa7   :  { %1488 = vmatpush3.bf16.msra.mxu0 %v2047_v14 }
  0xa8   :  { %1510 = vmatpush3.bf16.msra.mxu1 %v2050_v15  ;;  %1489 = vmatprep.subr.bf16.mxu0 %v2053_v16 }
  0xa9   :  { %1511 = vmatprep.subr.bf16.mxu1 %v2056_v17 }
  0xab   :  { %1490 = vmatpush3.bf16.msra.mxu0 %v2059_v18 }
  0xac   :  { %1512 = vmatpush3.bf16.msra.mxu1 %v2062_v19  ;;  %1491 = vmatprep.subr.bf16.mxu0 %v2065_v20 }
  0xad   :  { %1513 = vmatprep.subr.bf16.mxu1 %v2068_v21 }
  0xaf   :  { %1492 = vmatpush3.bf16.msra.mxu0 %v2071_v22 }
  0xb0   :  { %1514 = vmatpush3.bf16.msra.mxu1 %v2074_v23  ;;  %1493 = vmatprep.subr.bf16.mxu0 %v2077_v24 }
  0xb1   :  { %1515 = vmatprep.subr.bf16.mxu1 %v2080_v25 }
  0xb3   :  { %1494 = vmatpush3.bf16.msra.mxu0 %v2083_v26 }
  0xb4   :  { %1516 = vmatpush3.bf16.msra.mxu1 %v2086_v27  ;;  %1495 = vmatprep.subr.bf16.mxu0 %v2089_v28 }
  0xb5   :  { %1517 = vmatprep.subr.bf16.mxu1 %v2092_v29 }
  0xb7   :  { %1496 = vmatpush3.bf16.msra.mxu0 %v2095_v30 }
  0xb8   :  { %1518 = vmatpush3.bf16.msra.mxu1 %v2098_v31  ;;  %1525 = vmatprep.subr.bf16.mxu0 %v2102_v40 }
  0xb9   :  { %1547 = vmatprep.subr.bf16.mxu1 %v2104_v41 }
  0xba   :  { %837 = vmatmul.mubr.bf16.vlgmr.msra.gmra.mrb[8].mxu0 %v796_v60  ;;  %v2385_v60 = vld [vmem:[#allocation20_spill] sm:$0xff] }
  0xbb   :  { %877 = vmatmul.mubr.bf16.vlgmr.msra.gmra.mrb[8].mxu1 %v798_v62  ;;  %1526 = vmatpush3.bf16.msra.mxu0 %v2106_v42  ;;  %v2387_v62 = vld [vmem:[#allocation22_spill] sm:$0xff] }
  0xbc   :  { %1548 = vmatpush3.bf16.msra.mxu1 %v2110_v43  ;;  %1527 = vmatprep.subr.bf16.mxu0 %v2113_v44 }
  0xbd   :  { %1549 = vmatprep.subr.bf16.mxu1 %v2116_v45  ;;  %916 = vmatprep.mubr.bf16.mxu0 %v801_v32  ;;  %v2388_v32 = vld [vmem:[#allocation23_spill] sm:$0xff] }
  0xbe   :  { %956 = vmatprep.mubr.bf16.mxu1 %v803_v33  ;;  %v2389_v33 = vld [vmem:[#allocation24_spill] sm:$0xff] }
  0xbf   :  { %1528 = vmatpush3.bf16.msra.mxu0 %v2119_v46 }
  0xc0   :  { %1550 = vmatpush3.bf16.msra.mxu1 %v2122_v47  ;;  %1529 = vmatprep.subr.bf16.mxu0 %v2125_v48 }
  0xc1   :  { %1551 = vmatprep.subr.bf16.mxu1 %v2128_v49 }
  0xc3   :  { %1530 = vmatpush3.bf16.msra.mxu0 %v2131_v50 }
  0xc4   :  { %1552 = vmatpush3.bf16.msra.mxu1 %v2134_v51  ;;  %1531 = vmatprep.subr.bf16.mxu0 %v2137_v52 }
  0xc5   :  { %1553 = vmatprep.subr.bf16.mxu1 %v2140_v53 }
  0xc7   :  { %1532 = vmatpush3.bf16.msra.mxu0 %v2143_v54 }
  0xc8   :  { %1554 = vmatpush3.bf16.msra.mxu1 %v2146_v55  ;;  %1533 = vmatprep.subr.bf16.mxu0 %v2149_v56 }
  0xc9   :  { %1555 = vmatprep.subr.bf16.mxu1 %v2152_v57 }
  0xcb   :  { %1534 = vmatpush3.bf16.msra.mxu0 %v2379_v34  ;;  %v2390_v34 = vld [vmem:[#allocation25_spill] sm:$0xff] }
  0xcc   :  { %1556 = vmatpush3.bf16.msra.mxu1 %v2380_v35  ;;  %1535 = vmatprep.subr.bf16.mxu0 %v2381_v36  ;;  %v794_v35 = vld [vmem:[#allocation5 + $0x30] sm:$0xff]  ;;  %v800_v36 = vpack.c.bf16 %v792_v63, %v792_v63 }
  0xcd   :  { %1557 = vmatprep.subr.bf16.mxu1 %v2382_v37  ;;  %v968_v37 = vld [vmem:[#allocation7 + $0x8] sm:$0xff] }
  0xcf   :  { %1536 = vmatpush3.bf16.msra.mxu0 %v2383_v58  ;;  %v802_v58 = vpack.c.bf16 %v794_v35, %v794_v35 }
  0xd0   :  { %1558 = vmatpush3.bf16.msra.mxu1 %v2384_v59  ;;  %1537 = vmatprep.subr.bf16.mxu0 %v2385_v60  ;;  %v970_v59 = vld [vmem:[#allocation7 + $0x18] sm:$0xff] }
  0xd1   :  { %1559 = vmatprep.subr.bf16.mxu1 %v2386_v61 }
  0xd3   :  { %1538 = vmatpush3.bf16.msra.mxu0 %v2387_v62  ;;  %v976_v62 = vpack.c.bf16 %v968_v37, %v968_v37 }
  0xd4   :  { %1560 = vmatpush3.bf16.msra.mxu1 %v2388_v32  ;;  %1539 = vmatprep.subr.bf16.mxu0 %v2389_v33  ;;  %v978_v32 = vpack.c.bf16 %v970_v59, %v970_v59 }
  0xd5   :  { %1561 = vmatprep.subr.bf16.mxu1 %v2390_v34 }
  0xd7   :  { %1540 = vmatpush3.bf16.msra.mxu0 %v2191_v38 }
  0xd8   :  { %1562 = vmatpush3.bf16.msra.mxu1 %v2194_v39  ;;  %1569 = vmatprep.subr.bf16.mxu0 %v2006_v0  ;;  %v967_v0 = vld [vmem:[#allocation7] sm:$0xff] }
  0xd9   :  { %1591 = vmatprep.subr.bf16.mxu1 %v2008_v1  ;;  %v969_v1 = vld [vmem:[#allocation7 + $0x10] sm:$0xff] }
  0xda   :  { %917 = vmatmul.mubr.bf16.vlgmr.msra.gmra.mrb[12].mxu0 %v800_v36 }
  0xdb   :  { %957 = vmatmul.mubr.bf16.vlgmr.msra.gmra.mrb[12].mxu1 %v802_v58  ;;  %1570 = vmatpush3.bf16.msra.mxu0 %v2011_v2  ;;  %v975_v2 = vpack.c.bf16 %v967_v0, %v967_v0 }
  0xdc   :  { %1592 = vmatpush3.bf16.msra.mxu1 %v2014_v3  ;;  %1571 = vmatprep.subr.bf16.mxu0 %v2017_v4  ;;  %v972_v3 = vld [vmem:[#allocation7 + $0x28] sm:$0xff]  ;;  %v977_v4 = vpack.c.bf16 %v969_v1, %v969_v1 }
  0xdd   :  { %1593 = vmatprep.subr.bf16.mxu1 %v2020_v5  ;;  %1015 = vmatprep.mubr.bf16.mxu0 %v976_v62  ;;  %v974_v5 = vld [vmem:[#allocation7 + $0x38] sm:$0xff] }
  0xde   :  { %1055 = vmatprep.mubr.bf16.mxu1 %v978_v32 }
  0xdf   :  { %1572 = vmatpush3.bf16.msra.mxu0 %v2023_v6  ;;  %v980_v6 = vpack.c.bf16 %v972_v3, %v972_v3 }
  0xe0   :  { %1594 = vmatpush3.bf16.msra.mxu1 %v2026_v7  ;;  %1573 = vmatprep.subr.bf16.mxu0 %v2029_v8  ;;  %v982_v7 = vpack.c.bf16 %v974_v5, %v974_v5  ;;  %v2391_v8 = vld [vmem:[#allocation14_spill] sm:$0xff] }
  0xe1   :  { %1595 = vmatprep.subr.bf16.mxu1 %v2032_v9  ;;  %v2392_v9 = vld [vmem:[#allocation15_spill] sm:$0xff] }
  0xe3   :  { %1574 = vmatpush3.bf16.msra.mxu0 %v2035_v10  ;;  %v2393_v10 = vld [vmem:[#allocation16_spill] sm:$0xff] }
  0xe4   :  { %1596 = vmatpush3.bf16.msra.mxu1 %v2038_v11  ;;  %1575 = vmatprep.subr.bf16.mxu0 %v2041_v12  ;;  %v2394_v11 = vld [vmem:[#allocation17_spill] sm:$0xff]  ;;  %v2395_v12 = vld [vmem:[#allocation18_spill] sm:$0xff] }
  0xe5   :  { %1597 = vmatprep.subr.bf16.mxu1 %v2044_v13  ;;  %v2396_v13 = vld [vmem:[#allocation19_spill] sm:$0xff] }
  0xe7   :  { %1576 = vmatpush3.bf16.msra.mxu0 %v2047_v14  ;;  %v2397_v14 = vld [vmem:[#allocation22_spill] sm:$0xff] }
  0xe8   :  { %1598 = vmatpush3.bf16.msra.mxu1 %v2050_v15  ;;  %1577 = vmatprep.subr.bf16.mxu0 %v2053_v16  ;;  %v971_v15 = vld [vmem:[#allocation7 + $0x20] sm:$0xff]  ;;  %v2398_v16 = vld [vmem:[#allocation23_spill] sm:$0xff] }
  0xe9   :  { %1599 = vmatprep.subr.bf16.mxu1 %v2056_v17  ;;  %v973_v17 = vld [vmem:[#allocation7 + $0x30] sm:$0xff] }
  0xeb   :  { %1578 = vmatpush3.bf16.msra.mxu0 %v2059_v18  ;;  %v979_v18 = vpack.c.bf16 %v971_v15, %v971_v15 }
  0xec   :  { %1600 = vmatpush3.bf16.msra.mxu1 %v2062_v19  ;;  %1579 = vmatprep.subr.bf16.mxu0 %v2065_v20  ;;  %v981_v19 = vpack.c.bf16 %v973_v17, %v973_v17 }
  0xed   :  { %1601 = vmatprep.subr.bf16.mxu1 %v2068_v21 }
  0xef   :  { %1580 = vmatpush3.bf16.msra.mxu0 %v2071_v22 }
  0xf0   :  { %1602 = vmatpush3.bf16.msra.mxu1 %v2074_v23  ;;  %1581 = vmatprep.subr.bf16.mxu0 %v2077_v24 }
  0xf1   :  { %1603 = vmatprep.subr.bf16.mxu1 %v2080_v25 }
  0xf3   :  { %1582 = vmatpush3.bf16.msra.mxu0 %v2083_v26 }
  0xf4   :  { %1604 = vmatpush3.bf16.msra.mxu1 %v2086_v27  ;;  %1583 = vmatprep.subr.bf16.mxu0 %v2089_v28 }
  0xf5   :  { %1605 = vmatprep.subr.bf16.mxu1 %v2092_v29 }
  0xf7   :  { %1584 = vmatpush3.bf16.msra.mxu0 %v2095_v30 }
  0xf8   :  { %1606 = vmatpush3.bf16.msra.mxu1 %v2098_v31  ;;  %1613 = vmatprep.subr.bf16.mxu0 %v2102_v40  ;;  %v1758_v31 = vld [vmem:[#allocation10] sm:$0xff]   ;;  %v1759_v40 = vld [vmem:[#allocation10 + $0x8] sm:$0xff]  }
  0xf9   :  { %1635 = vmatprep.subr.bf16.mxu1 %v2104_v41  ;;  %v1760_v41 = vld [vmem:[#allocation10 + $0x10] sm:$0xff]  }
  0xfa   :  { %1016 = vmatmul.mubr.bf16.vlgmr.msra.gmra.mrb[16].mxu0 %v975_v2 }
  0xfb   :  { %1056 = vmatmul.mubr.bf16.vlgmr.msra.gmra.mrb[16].mxu1 %v977_v4  ;;  %1614 = vmatpush3.bf16.msra.mxu0 %v2106_v42  ;;  %v1761_v42 = vld [vmem:[#allocation10 + $0x18] sm:$0xff]   ;;  %v1383_v4 = vld [vmem:[%s2339_s4] ss:$0 sm:$0xff] }
  0xfc   :  { %1636 = vmatpush3.bf16.msra.mxu1 %v2110_v43  ;;  %1615 = vmatprep.subr.bf16.mxu0 %v2113_v44  ;;  %v1762_v43 = vld [vmem:[#allocation10 + $0x20] sm:$0xff]  }
  0xfd   :  { %1637 = vmatprep.subr.bf16.mxu1 %v2116_v45  ;;  %1095 = vmatprep.mubr.bf16.mxu0 %v980_v6 }
  0xfe   :  { %1135 = vmatprep.mubr.bf16.mxu1 %v982_v7 }
  0xff   :  { %1616 = vmatpush3.bf16.msra.mxu0 %v2119_v46 }
 0x100   :  { %1638 = vmatpush3.bf16.msra.mxu1 %v2122_v47  ;;  %1617 = vmatprep.subr.bf16.mxu0 %v2125_v48  ;;  %v1763_v47 = vld [vmem:[#allocation10 + $0x28] sm:$0xff]  }
 0x101   :  { %1639 = vmatprep.subr.bf16.mxu1 %v2128_v49 }
 0x103   :  { %1618 = vmatpush3.bf16.msra.mxu0 %v2131_v50 }
 0x104   :  { %1640 = vmatpush3.bf16.msra.mxu1 %v2134_v51  ;;  %1619 = vmatprep.subr.bf16.mxu0 %v2137_v52 }
 0x105   :  { %1641 = vmatprep.subr.bf16.mxu1 %v2140_v53 }
 0x107   :  { %1620 = vmatpush3.bf16.msra.mxu0 %v2143_v54 }
 0x108   :  { %1642 = vmatpush3.bf16.msra.mxu1 %v2146_v55  ;;  %1621 = vmatprep.subr.bf16.mxu0 %v2149_v56  ;;  %v1764_v56 = vld [vmem:[#allocation10 + $0x30] sm:$0xff]  }
 0x109   :  { %1643 = vmatprep.subr.bf16.mxu1 %v2152_v57 }
 0x10b   :  { %1622 = vmatpush3.bf16.msra.mxu0 %v2391_v8 }
 0x10c   :  { %1644 = vmatpush3.bf16.msra.mxu1 %v2392_v9  ;;  %1623 = vmatprep.subr.bf16.mxu0 %v2393_v10 }
 0x10d   :  { %1645 = vmatprep.subr.bf16.mxu1 %v2394_v11 }
 0x10f   :  { %1624 = vmatpush3.bf16.msra.mxu0 %v2395_v12 }
 0x110   :  { %1646 = vmatpush3.bf16.msra.mxu1 %v2396_v13  ;;  %1625 = vmatprep.subr.bf16.mxu0 %v2385_v60 }
 0x111   :  { %1647 = vmatprep.subr.bf16.mxu1 %v2386_v61 }
 0x113   :  { %1626 = vmatpush3.bf16.msra.mxu0 %v2397_v14 }
 0x114   :  { %1648 = vmatpush3.bf16.msra.mxu1 %v2398_v16  ;;  %1627 = vmatprep.subr.bf16.mxu0 %v2389_v33 }
 0x115   :  { %1649 = vmatprep.subr.bf16.mxu1 %v2390_v34 }
 0x117   :  { %1628 = vmatpush3.bf16.msra.mxu0 %v2191_v38  ;;  %v1765_v38 = vld [vmem:[#allocation10 + $0x38] sm:$0xff]  }
 0x118   :  { %1650 = vmatpush3.bf16.msra.mxu1 %v2194_v39  ;;  %1667 = vmatprep.subr.bf16.mxu0 %v1758_v31 }
 0x11a   :  { %1096 = vmatmul.mubr.bf16.vlgmr.msra.gmra.mrb[20].mxu0 %v979_v18 }
 0x11b   :  { %1136 = vmatmul.mubr.bf16.vlgmr.msra.gmra.mrb[20].mxu1 %v981_v19  ;;  %1668 = vmatpush3.bf16.msra.mxu0 %v1758_v31 }
 0x11c   :  { %1669 = vmatprep.subr.bf16.mxu0 %v1759_v40 }
 0x11f   :  { %1670 = vmatpush3.bf16.msra.mxu0 %v1759_v40 }
 0x120   :  { %1671 = vmatprep.subr.bf16.mxu0 %v1760_v41 }
 0x123   :  { %1672 = vmatpush3.bf16.msra.mxu0 %v1760_v41 }
 0x124   :  { %1673 = vmatprep.subr.bf16.mxu0 %v1761_v42 }
 0x127   :  { %1674 = vmatpush3.bf16.msra.mxu0 %v1761_v42 }
 0x128   :  { %1675 = vmatprep.subr.bf16.mxu0 %v1762_v43 }
 0x12b   :  { %1676 = vmatpush3.bf16.msra.mxu0 %v1762_v43 }
 0x12c   :  { %1677 = vmatprep.subr.bf16.mxu0 %v1763_v47 }
 0x12f   :  { %1678 = vmatpush3.bf16.msra.mxu0 %v1763_v47 }
 0x130   :  { %1679 = vmatprep.subr.bf16.mxu0 %v1764_v56 }
 0x133   :  { %1680 = vmatpush3.bf16.msra.mxu0 %v1764_v56 }
 0x134   :  { %1681 = vmatprep.subr.bf16.mxu0 %v1765_v38 }
 0x137   :  { %1682 = vmatpush3.bf16.msra.mxu0 %v1765_v38 }
 0x14d   :  { %v1409_v20 = vpop.f32.mrb[0].mxu0 }
 0x14e   :  { %v1431_v21 = vpop.f32.mrb[0].mxu1  ;;  %v1410_v22 = vpop.f32.mrb[1].mxu0 }
 0x14f   :  { %v1432_v23 = vpop.f32.mrb[1].mxu1  ;;  %v1411_v24 = vadd.f32 %v1410_v22, %v1409_v20  ;;  %v1412_v26 = vpop.f32.mrb[2].mxu0 }
 0x150   :  { %v1433_v25 = vadd.f32 %v1432_v23, %v1431_v21  ;;  %v1434_v27 = vpop.f32.mrb[2].mxu1  ;;  %v1413_v28 = vpop.f32.mrb[3].mxu0 }
 0x151   :  { %v1435_v29 = vpop.f32.mrb[3].mxu1 }
 0x152   :  { %v700_v30 = vadd.f32 %v1433_v25, %v1411_v24 }
 0x16d   :  { %v1453_v44 = vpop.f32.mrb[4].mxu0 }
 0x16e   :  { %v1475_v45 = vpop.f32.mrb[4].mxu1  ;;  %v1454_v46 = vpop.f32.mrb[5].mxu0 }
 0x16f   :  { %v1455_v48 = vadd.f32 %v1454_v46, %v1453_v44  ;;  %v1476_v49 = vpop.f32.mrb[5].mxu1  ;;  %v1456_v50 = vpop.f32.mrb[6].mxu0 }
 0x170   :  { %v1477_v51 = vadd.f32 %v1476_v49, %v1475_v45  ;;  %v1478_v52 = vpop.f32.mrb[6].mxu1  ;;  %v1457_v53 = vpop.f32.mrb[7].mxu0  ;;  %v1384_v50 = vld [vmem:[%s2341_s6] ss:$0 sm:$0xff] }
 0x171   :  { %v740_v54 = vadd.f32 %v1455_v48, %v700_v30  ;;  %v1479_v55 = vpop.f32.mrb[7].mxu1 }
 0x173   :  { %v780_v57 = vadd.f32 %v1477_v51, %v740_v54 }
 0x175   :  { %v1158_v10 = vadd.f32 %v1383_v4, %v780_v57 }
 0x177   :  { %v1161_v13 = vmax.f32 %v1158_v10, 0.0 }
 0x18d   :  { %v1497_v39 = vpop.f32.mrb[8].mxu0 }
 0x18e   :  { %v1519_v34 = vpop.f32.mrb[8].mxu1  ;;  %v1498_v35 = vpop.f32.mrb[9].mxu0 }
 0x18f   :  { %v1499_v36 = vadd.f32 %v1498_v35, %v1497_v39  ;;  %v1520_v37 = vpop.f32.mrb[9].mxu1  ;;  %v1500_v58 = vpop.f32.mrb[10].mxu0 }
 0x190   :  { %v1521_v59 = vadd.f32 %v1520_v37, %v1519_v34  ;;  %v1522_v60 = vpop.f32.mrb[10].mxu1  ;;  %v1501_v61 = vpop.f32.mrb[11].mxu0 }
 0x191   :  { %v1523_v62 = vpop.f32.mrb[11].mxu1 }
 0x192   :  { %v879_v63 = vadd.f32 %v1521_v59, %v1499_v36 }
 0x1ad   :  { %v1541_v32 = vpop.f32.mrb[12].mxu0 }
 0x1ae   :  { %v1563_v33 = vpop.f32.mrb[12].mxu1  ;;  %v1542_v0 = vpop.f32.mrb[13].mxu0 }
 0x1af   :  { %v1543_v1 = vadd.f32 %v1542_v0, %v1541_v32  ;;  %v1564_v2 = vpop.f32.mrb[13].mxu1  ;;  %v1544_v3 = vpop.f32.mrb[14].mxu0 }
 0x1b0   :  { %v1565_v5 = vadd.f32 %v1564_v2, %v1563_v33  ;;  %v1566_v6 = vpop.f32.mrb[14].mxu1  ;;  %v1545_v7 = vpop.f32.mrb[15].mxu0 }
 0x1b1   :  { %v919_v8 = vadd.f32 %v1543_v1, %v879_v63  ;;  %v1567_v9 = vpop.f32.mrb[15].mxu1 }
 0x1b3   :  { %v959_v11 = vadd.f32 %v1565_v5, %v919_v8 }
 0x1b5   :  { %v1159_v12 = vadd.f32 %v1383_v4, %v959_v11 }
 0x1b7   :  { %v1162_v14 = vmax.f32 %v1159_v12, 0.0 }
 0x1b9   :  { %v1164_v15 = vpack.c.bf16 %v1162_v14, %v1161_v13 }
 0x1bb   :  { %1683 = vmatprep.mubr.bf16.mxu0 %v1164_v15 }
 0x1cd   :  { %v1585_v16 = vpop.f32.mrb[16].mxu0 }
 0x1ce   :  { %v1607_v17 = vpop.f32.mrb[16].mxu1  ;;  %v1586_v18 = vpop.f32.mrb[17].mxu0 }
 0x1cf   :  { %v1587_v19 = vadd.f32 %v1586_v18, %v1585_v16  ;;  %v1608_v20 = vpop.f32.mrb[17].mxu1  ;;  %v1588_v21 = vpop.f32.mrb[18].mxu0 }
 0x1d0   :  { %v1609_v22 = vadd.f32 %v1608_v20, %v1607_v17  ;;  %v1610_v23 = vpop.f32.mrb[18].mxu1  ;;  %v1589_v24 = vpop.f32.mrb[19].mxu0 }
 0x1d1   :  { %v1611_v25 = vpop.f32.mrb[19].mxu1 }
 0x1d2   :  { %v1058_v26 = vadd.f32 %v1609_v22, %v1587_v19 }
 0x1ed   :  { %v1629_v27 = vpop.f32.mrb[20].mxu0 }
 0x1ee   :  { %v1651_v28 = vpop.f32.mrb[20].mxu1  ;;  %v1630_v29 = vpop.f32.mrb[21].mxu0 }
 0x1ef   :  { %v1631_v30 = vadd.f32 %v1630_v29, %v1629_v27  ;;  %v1652_v31 = vpop.f32.mrb[21].mxu1  ;;  %v1632_v40 = vpop.f32.mrb[22].mxu0 }
 0x1f0   :  { %v1653_v41 = vadd.f32 %v1652_v31, %v1651_v28  ;;  %v1654_v42 = vpop.f32.mrb[22].mxu1  ;;  %v1633_v43 = vpop.f32.mrb[23].mxu0 }
 0x1f1   :  { %v1098_v44 = vadd.f32 %v1631_v30, %v1058_v26  ;;  %v1655_v45 = vpop.f32.mrb[23].mxu1 }
 0x1f3   :  { %v1138_v46 = vadd.f32 %v1653_v41, %v1098_v44 }
 0x1f5   :  { %v1160_v47 = vadd.f32 %v1383_v4, %v1138_v46 }
 0x1f7   :  { %v1163_v48 = vmax.f32 %v1160_v47, 0.0 }
 0x1f9   :  { %v1165_v49 = vpack.c.bf16 %v1163_v48, %v1163_v48 }
 0x1fb   :  { %1684 = vmatmul.mubr.bf16.vlgmr.msra.gmra.mrb[24].mxu0 %v1165_v49 }
 0x2ce   :  { %v1685_v51 = vpop.f32.mrb[24].mxu0 }
 0x2cf   :  { %v1280_v52 = vadd.f32 %v1685_v51, %v1384_v50  ;;  %v1271_v53 = vpop.f32.mrb[25].mxu0 }
 0x2d0   :  { %v1272_v54 = vadd.f32 %v1384_v50, %v1271_v53  ;;  %v1686_v55 = vpop.f32.mrb[26].mxu0 }
 0x2d1   :  { %v1274_v56 = vpop.f32.mrb[27].mxu0  ;;  %v1291_v57 = vmul.f32 %v1280_v52, %v1280_v52 }
 0x2d2   :  { %v1275_v38 = vadd.f32 %v1384_v50, %v1274_v56  ;;  %v1285_v39 = vmul.f32 %v1272_v54, %v1272_v54  ;;  %v1297_v34 = vmul.f32 %v1280_v52, %v1272_v54 }
 0x2d3   :  { %1292 = vadd.xlane.f32.xlu1 %v1291_v57 }
 0x2d4   :  { %1286 = vadd.xlane.f32.xlu0 %v1285_v39  ;;  %v1294_v35 = vmul.f32 %v1275_v38, %v1272_v54  ;;  %v1288_v36 = vmul.f32 %v1275_v38, %v1275_v38 }
 0x2d7   :  { %1295 = vadd.xlane.f32.xlu1 %v1294_v35 }
 0x2d8   :  { %1289 = vadd.xlane.f32.xlu0 %v1288_v36 }
 0x2dc   :  { %1298 = vadd.xlane.f32.xlu0 %v1297_v34 }
 0x360   :  { %v1293_v37 = vpop.xlane.xlu1 %1292 }
 0x361   :  { %v1287_v58 = vpop.xlane.xlu0 %1286 }
 0x362   :  { %v1304_v59 = vmul.f32 %v1293_v37, %v1287_v58 }
 0x364   :  { %v1305_v60 = vmax.f32 %v1304_v59, 1e-16  ;;  %v1296_v0 = vpop.xlane.xlu1 %1295 }
 0x365   :  { %v1290_v61 = vpop.xlane.xlu0 %1289 }
 0x366   :  { %v1300_v62 = vmul.f32 %v1290_v61, %v1287_v58  ;;  %1766 = vrsqrt.f32 %v1305_v60 }
 0x368   :  { %v1301_v63 = vmax.f32 %v1300_v62, 1e-16 }
 0x369   :  { %v1299_v1 = vpop.xlane.xlu0 %1298 }
 0x36a   :  { %1768 = vrsqrt.f32 %v1301_v63 }
 0x370   :  { %v1767_v32 = vpop.eup %1766 }
 0x371   :  { %v1307_v3 = vmul.f32 %v1767_v32, %v1299_v1 }
 0x374   :  { %v1769_v33 = vpop.eup %1768 }
 0x375   :  { %v1303_v2 = vmul.f32 %v1769_v33, %v1296_v0 }
 0x377   :  { %v1309_v4 = vsel %vm1308_vm0, %v1303_v2, %v1307_v3 }
 0x378   :  { %1311 = vst.msk [vmem:[%s2342_s7] sm:$0xff] %vm1310_vm1, %v1309_v4 }
 0x379   :  { %1316 = vsyncpa [#allocation4], 1 }
 0x37a   :  { %1317 = vsyncpa [#allocation6], 1 }
 0x37b   :  { %1318 = vsyncpa [#allocation9], 1 }

</bundles_post_ra>
